<compile_context>
chip_gen: v6e
topology: v6e:2x2x1
jax: 0.10.0
libtpu: 0.0.40
codegen_flags: <defaults>
</compile_context>

<pallas_src>
import functools

import jax
import jax.numpy as jnp
from jax.experimental import pallas as pl
from jax.experimental.pallas import tpu as pltpu

ACTIVATION = jnp.tanh          # getattr(nn, args.policy_activation)()
MATMUL_DTYPE = jnp.bfloat16    # MXU operand dtype (f32 accumulation)
LANE = 128
SUBLANE = 8


def _round_up(n, m):
    return ((n + m - 1) // m) * m


def _cdiv(a, b):
    return -(-a // b)


# ----------------------------------------------------------------------------
# Kernel
# ----------------------------------------------------------------------------

def _mlp_kernel(num_layers, *refs):
    """refs = (x_ref, w0, b0, w1, b1, ..., w_{L-1}, b_{L-1}, out_ref).

    One grid step processes a (TB, obs_dim) batch tile.  All matmuls, bias
    adds and activations happen in VMEM/vregs.  No activation after the final
    layer (logits).
    """
    x_ref = refs[0]
    out_ref = refs[-1]
    param_refs = refs[1:-1]

    # Cast activations to bf16 once for the MXU; accumulate in f32.
    h = x_ref[...].astype(MATMUL_DTYPE)
    for layer in range(num_layers):
        w = param_refs[2 * layer][...]        # bf16 [in(_pad), out_pad]
        b = param_refs[2 * layer + 1][...]    # f32  [1,        out_pad]
        z = jnp.dot(h, w, preferred_element_type=jnp.float32) + b   # f32
        if layer != num_layers - 1:
            # Activation in f32, then immediately narrow the inter-layer
            # temporary to bf16 (same value the next matmul would cast anyway).
            h = ACTIVATION(z).astype(MATMUL_DTYPE)
        else:
            out_ref[...] = z.astype(out_ref.dtype)


# ----------------------------------------------------------------------------
# Wrapper
# ----------------------------------------------------------------------------

def _choose_batch_tile(B, block_b):
    """Pick (tb, b_pad): tb multiple of 8, bounded padding waste, and at least
    2 grid steps whenever B > 8 so v7x can shard the batch across its 2 TCs."""
    b8 = _round_up(max(B, 1), SUBLANE)
    n_steps = max(_cdiv(b8, block_b), 1)
    if b8 > SUBLANE:
        n_steps = max(n_steps, 2)
    tb = _round_up(_cdiv(b8, n_steps), SUBLANE)
    b_pad = _round_up(b8, tb)
    return tb, b_pad


def qreps_policy_forward(x, kernel_params, n_actions, *, block_b=2048):
    """x: [B, obs_dim] f32.

    kernel_params: list of (W bf16, b f32[1, out_pad]); first W has an
    unpadded input dim (obs_dim), every out dim is padded to a multiple of 128.
    """
    B, obs_dim = x.shape
    num_layers = len(kernel_params)
    assert kernel_params[0][0].shape[0] == obs_dim
    out_pad = kernel_params[-1][0].shape[1]

    tb, b_pad = _choose_batch_tile(B, block_b)
    grid = b_pad // tb

    # Zero-pad only the batch remainder (padded rows are exact zeros, sliced
    # away at the end; feature dim stays unpadded -> no extra HBM stream).
    if b_pad != B:
        x_in = jnp.zeros((b_pad, obs_dim), x.dtype).at[:B].set(x)
    else:
        x_in = x

    flat_params = []
    in_specs = [pl.BlockSpec((tb, obs_dim), lambda i: (i, 0))]
    for w, b in kernel_params:
        flat_params.append(w)
        flat_params.append(b)
        # Full-array blocks with constant index maps -> VMEM-resident weights.
        in_specs.append(pl.BlockSpec(w.shape, lambda i: (0, 0)))
        in_specs.append(pl.BlockSpec(b.shape, lambda i: (0, 0)))
    out_specs = pl.BlockSpec((tb, out_pad), lambda i: (i, 0))

    # Advisory cost estimate for XLA's scheduler.
    flops = sum(2 * b_pad * w.shape[0] * w.shape[1] for w, _ in kernel_params)
    transcendentals = b_pad * sum(w.shape[1] for w, _ in kernel_params[:-1])
    bytes_accessed = int(
        x_in.size * x_in.dtype.itemsize
        + sum(w.size * 2 + b.size * 4 for w, b in kernel_params)
        + b_pad * out_pad * 4
    )

    kernel = functools.partial(_mlp_kernel, num_layers)
    out = pl.pallas_call(
        kernel,
        out_shape=jax.ShapeDtypeStruct((b_pad, out_pad), jnp.float32),
        grid=(grid,),
        in_specs=in_specs,
        out_specs=out_specs,
        compiler_params=pltpu.CompilerParams(
            dimension_semantics=("parallel",),
        ),
        cost_estimate=pl.CostEstimate(
            flops=int(flops),
            transcendentals=int(transcendentals),
            bytes_accessed=bytes_accessed,
        ),
    )(x_in, *flat_params)

    # Keep the kernel's output lane-dense at 128; slice once here.
    # (Padded action lanes are exactly 0 -- mask with -inf instead of slicing
    #  if you ever feed the padded logits directly into a softmax.)
    return out[:B, :n_actions]


# ----------------------------------------------------------------------------
# Parameter construction (deterministic analogue of torch layer_init).
# ----------------------------------------------------------------------------

def layer_init(key, in_dim, out_dim, std):
    """Orthogonal weight (torch shape [out, in]), zero bias; returned as
    (W [in, out] f32, b [out] f32) ready for `h @ W + b`."""
    w_torch = jax.nn.initializers.orthogonal(scale=std)(
        key, (out_dim, in_dim), jnp.float32
    )
    return jnp.transpose(w_torch), jnp.zeros((out_dim,), jnp.float32)


def build_qreps_policy_params(key, obs_dim, hidden_size, num_hidden_layers, n_actions):
    params = []
    key, sub = jax.random.split(key)
    params.append(layer_init(sub, obs_dim, hidden_size, std=2.0 ** 0.5))
    for _ in range(num_hidden_layers):
        key, sub = jax.random.split(key)
        params.append(layer_init(sub, hidden_size, hidden_size, std=2.0 ** 0.5))
    key, sub = jax.random.split(key)
    params.append(layer_init(sub, hidden_size, n_actions, std=0.01))
    return params


def prepare_kernel_params(params):
    """Pad output (and matching hidden input) dims to 128-lane multiples with
    zeros, keep the FIRST layer's input dim unpadded (x feature dim is passed
    unpadded), and cast weights to bf16 for the MXU.  Biases stay f32 [1, out_pad].

    Zero padding is exact: tanh(0) = 0 and padded weight rows/cols are zero.
    """
    kparams = []
    prev_out_pad = None
    for idx, (w, b) in enumerate(params):
        in_dim, out_dim = w.shape
        in_pad = in_dim if idx == 0 else prev_out_pad
        out_pad = _round_up(out_dim, LANE)
        w_p = jnp.zeros((in_pad, out_pad), jnp.float32).at[:in_dim, :out_dim].set(w)
        b_p = jnp.zeros((1, out_pad), jnp.float32).at[0, :out_dim].set(b)
        kparams.append((w_p.astype(MATMUL_DTYPE), b_p))
        prev_out_pad = out_pad
    return kparams


# ----------------------------------------------------------------------------
# References
# ----------------------------------------------------------------------------

def reference_forward_f32(x, params):
    """Exact module math in f32 (unpadded)."""
    h = x
    for i, (w, b) in enumerate(params):
        h = h @ w + b
        if i != len(params) - 1:
            h = ACTIVATION(h)
    return h


def reference_forward_matched(x, kernel_params, n_actions):
    """Same bf16-operand / f32-accumulate recipe as the kernel, in plain jnp."""
    h = x.astype(MATMUL_DTYPE)
    for i, (w, b) in enumerate(kernel_params):
        z = jnp.dot(h, w, preferred_element_type=jnp.float32) + b
        if i != len(kernel_params) - 1:
            h = ACTIVATION(z).astype(MATMUL_DTYPE)
        else:
            h = z
    return h[:, :n_actions]


if __name__ == "__main__":
    # Small shapes consistent with the module.
    batch = 12             # exercises batch-remainder padding and grid=2
    obs_dim = 16           # np.prod(env.single_observation_space.shape)
    hidden_size = 32       # args.hidden_size
    num_hidden_layers = 2  # args.num_hidden_layers
    n_actions = 4          # env.single_action_space.n

    key = jax.random.PRNGKey(0)
    pkey, xkey = jax.random.split(key)
    params = build_qreps_policy_params(
        pkey, obs_dim, hidden_size, num_hidden_layers, n_actions
    )
    kernel_params = prepare_kernel_params(params)
    x = jax.random.normal(xkey, (batch, obs_dim), jnp.float32)

    logits = qreps_policy_forward(x, kernel_params, n_actions)
    jax.block_until_ready(logits)
    assert logits.shape == (batch, n_actions)

    # Check against a jnp reference using the same bf16-operand / f32-accumulate
    # recipe, plus a looser check against pure-f32 module math.
    ref_matched = reference_forward_matched(x, kernel_params, n_actions)
    ref_f32 = reference_forward_f32(x, params)
    assert jnp.allclose(logits, ref_matched, atol=1e-3, rtol=1e-3)
    assert jnp.allclose(logits, ref_f32, atol=2e-2, rtol=2e-2)

    print("KERNEL_OK")
</pallas_src>

<mosaic_0001>
module attributes {stable_mosaic.version = 11 : i64} {
  func.func @_mlp_kernel(%arg0: i32, %arg1: memref<8x16xf32, #tpu.memory_space<vmem>>, %arg2: memref<16x128xbf16, #tpu.memory_space<vmem>>, %arg3: memref<1x128xf32, #tpu.memory_space<vmem>>, %arg4: memref<128x128xbf16, #tpu.memory_space<vmem>>, %arg5: memref<1x128xf32, #tpu.memory_space<vmem>>, %arg6: memref<128x128xbf16, #tpu.memory_space<vmem>>, %arg7: memref<1x128xf32, #tpu.memory_space<vmem>>, %arg8: memref<128x128xbf16, #tpu.memory_space<vmem>>, %arg9: memref<1x128xf32, #tpu.memory_space<vmem>>, %arg10: memref<8x128xf32, #tpu.memory_space<vmem>>) attributes {dimension_semantics = [#tpu.dimension_semantics<parallel>], iteration_bounds = array<i64: 2>, scalar_prefetch = 0 : i64, scratch_operands = 0 : i64, tpu.core_type = #tpu.core_type<tc>, window_params = [{transform_indices = @transform_0, window_bounds = array<i64: 8, 16>}, {pipeline_mode = #tpu.pipeline_mode<synchronous>, transform_indices = @transform_1, window_bounds = array<i64: 16, 128>}, {pipeline_mode = #tpu.pipeline_mode<synchronous>, transform_indices = @transform_2, window_bounds = array<i64: 1, 128>}, {pipeline_mode = #tpu.pipeline_mode<synchronous>, transform_indices = @transform_3, window_bounds = array<i64: 128, 128>}, {pipeline_mode = #tpu.pipeline_mode<synchronous>, transform_indices = @transform_4, window_bounds = array<i64: 1, 128>}, {pipeline_mode = #tpu.pipeline_mode<synchronous>, transform_indices = @transform_5, window_bounds = array<i64: 128, 128>}, {pipeline_mode = #tpu.pipeline_mode<synchronous>, transform_indices = @transform_6, window_bounds = array<i64: 1, 128>}, {pipeline_mode = #tpu.pipeline_mode<synchronous>, transform_indices = @transform_7, window_bounds = array<i64: 128, 128>}, {pipeline_mode = #tpu.pipeline_mode<synchronous>, transform_indices = @transform_8, window_bounds = array<i64: 1, 128>}, {transform_indices = @transform_9, window_bounds = array<i64: 8, 128>}]} {
    %c0 = arith.constant 0 : index
    %c0_0 = arith.constant 0 : index
    %0 = vector.load %arg1[%c0, %c0_0] : memref<8x16xf32, #tpu.memory_space<vmem>>, vector<8x16xf32>
    %1 = arith.truncf %0 : vector<8x16xf32> to vector<8x16xbf16>
    %c0_1 = arith.constant 0 : index
    %c0_2 = arith.constant 0 : index
    %2 = vector.load %arg2[%c0_1, %c0_2] : memref<16x128xbf16, #tpu.memory_space<vmem>>, vector<16x128xbf16>
    %c0_3 = arith.constant 0 : index
    %c0_4 = arith.constant 0 : index
    %3 = vector.load %arg3[%c0_3, %c0_4] : memref<1x128xf32, #tpu.memory_space<vmem>>, vector<1x128xf32>
    %cst = arith.constant dense<0.000000e+00> : vector<8x128xf32>
    %4 = tpu.matmul %1, %2, %cst {dimension_numbers = #tpu.dot_dimension_numbers<[1], [0], [0], [1], [0, 0, 1, 1], [], []>} : vector<8x16xbf16>, vector<16x128xbf16>, vector<8x128xf32> -> vector<8x128xf32>
    %5 = vector.broadcast %3 : vector<1x128xf32> to vector<8x128xf32>
    %6 = arith.addf %4, %5 : vector<8x128xf32>
    %7 = math.tanh %6 : vector<8x128xf32>
    %8 = arith.truncf %7 : vector<8x128xf32> to vector<8x128xbf16>
    %c0_5 = arith.constant 0 : index
    %c0_6 = arith.constant 0 : index
    %9 = vector.load %arg4[%c0_5, %c0_6] : memref<128x128xbf16, #tpu.memory_space<vmem>>, vector<128x128xbf16>
    %c0_7 = arith.constant 0 : index
    %c0_8 = arith.constant 0 : index
    %10 = vector.load %arg5[%c0_7, %c0_8] : memref<1x128xf32, #tpu.memory_space<vmem>>, vector<1x128xf32>
    %cst_9 = arith.constant dense<0.000000e+00> : vector<8x128xf32>
    %11 = tpu.matmul %8, %9, %cst_9 {dimension_numbers = #tpu.dot_dimension_numbers<[1], [0], [0], [1], [0, 0, 1, 1], [], []>} : vector<8x128xbf16>, vector<128x128xbf16>, vector<8x128xf32> -> vector<8x128xf32>
    %12 = vector.broadcast %10 : vector<1x128xf32> to vector<8x128xf32>
    %13 = arith.addf %11, %12 : vector<8x128xf32>
    %14 = math.tanh %13 : vector<8x128xf32>
    %15 = arith.truncf %14 : vector<8x128xf32> to vector<8x128xbf16>
    %c0_10 = arith.constant 0 : index
    %c0_11 = arith.constant 0 : index
    %16 = vector.load %arg6[%c0_10, %c0_11] : memref<128x128xbf16, #tpu.memory_space<vmem>>, vector<128x128xbf16>
    %c0_12 = arith.constant 0 : index
    %c0_13 = arith.constant 0 : index
    %17 = vector.load %arg7[%c0_12, %c0_13] : memref<1x128xf32, #tpu.memory_space<vmem>>, vector<1x128xf32>
    %cst_14 = arith.constant dense<0.000000e+00> : vector<8x128xf32>
    %18 = tpu.matmul %15, %16, %cst_14 {dimension_numbers = #tpu.dot_dimension_numbers<[1], [0], [0], [1], [0, 0, 1, 1], [], []>} : vector<8x128xbf16>, vector<128x128xbf16>, vector<8x128xf32> -> vector<8x128xf32>
    %19 = vector.broadcast %17 : vector<1x128xf32> to vector<8x128xf32>
    %20 = arith.addf %18, %19 : vector<8x128xf32>
    %21 = math.tanh %20 : vector<8x128xf32>
    %22 = arith.truncf %21 : vector<8x128xf32> to vector<8x128xbf16>
    %c0_15 = arith.constant 0 : index
    %c0_16 = arith.constant 0 : index
    %23 = vector.load %arg8[%c0_15, %c0_16] : memref<128x128xbf16, #tpu.memory_space<vmem>>, vector<128x128xbf16>
    %c0_17 = arith.constant 0 : index
    %c0_18 = arith.constant 0 : index
    %24 = vector.load %arg9[%c0_17, %c0_18] : memref<1x128xf32, #tpu.memory_space<vmem>>, vector<1x128xf32>
    %cst_19 = arith.constant dense<0.000000e+00> : vector<8x128xf32>
    %25 = tpu.matmul %22, %23, %cst_19 {dimension_numbers = #tpu.dot_dimension_numbers<[1], [0], [0], [1], [0, 0, 1, 1], [], []>} : vector<8x128xbf16>, vector<128x128xbf16>, vector<8x128xf32> -> vector<8x128xf32>
    %26 = vector.broadcast %24 : vector<1x128xf32> to vector<8x128xf32>
    %27 = arith.addf %25, %26 : vector<8x128xf32>
    %c0_20 = arith.constant 0 : index
    %c0_21 = arith.constant 0 : index
    %28 = vector.load %arg10[%c0_20, %c0_21] : memref<8x128xf32, #tpu.memory_space<vmem>>, vector<8x128xf32>
    tpu.vector_store %arg10[%c0_20, %c0_21], %27 {strides = array<i32>} : memref<8x128xf32, #tpu.memory_space<vmem>>, vector<8x128xf32>,
    return
  }
  func.func @transform_0(%arg0: i32) -> (i32, i32) {
    %c0_i32 = arith.constant 0 : i32
    %c0_i32_0 = arith.constant 0 : i32
    return %arg0, %c0_i32 : i32, i32
  }
  func.func @transform_1(%arg0: i32) -> (i32, i32) {
    %c0_i32 = arith.constant 0 : i32
    %c0_i32_0 = arith.constant 0 : i32
    %c0_i32_1 = arith.constant 0 : i32
    return %c0_i32, %c0_i32_0 : i32, i32
  }
  func.func @transform_2(%arg0: i32) -> (i32, i32) {
    %c0_i32 = arith.constant 0 : i32
    %c0_i32_0 = arith.constant 0 : i32
    %c0_i32_1 = arith.constant 0 : i32
    return %c0_i32, %c0_i32_0 : i32, i32
  }
  func.func @transform_3(%arg0: i32) -> (i32, i32) {
    %c0_i32 = arith.constant 0 : i32
    %c0_i32_0 = arith.constant 0 : i32
    %c0_i32_1 = arith.constant 0 : i32
    return %c0_i32, %c0_i32_0 : i32, i32
  }
  func.func @transform_4(%arg0: i32) -> (i32, i32) {
    %c0_i32 = arith.constant 0 : i32
    %c0_i32_0 = arith.constant 0 : i32
    %c0_i32_1 = arith.constant 0 : i32
    return %c0_i32, %c0_i32_0 : i32, i32
  }
  func.func @transform_5(%arg0: i32) -> (i32, i32) {
    %c0_i32 = arith.constant 0 : i32
    %c0_i32_0 = arith.constant 0 : i32
    %c0_i32_1 = arith.constant 0 : i32
    return %c0_i32, %c0_i32_0 : i32, i32
  }
  func.func @transform_6(%arg0: i32) -> (i32, i32) {
    %c0_i32 = arith.constant 0 : i32
    %c0_i32_0 = arith.constant 0 : i32
    %c0_i32_1 = arith.constant 0 : i32
    return %c0_i32, %c0_i32_0 : i32, i32
  }
  func.func @transform_7(%arg0: i32) -> (i32, i32) {
    %c0_i32 = arith.constant 0 : i32
    %c0_i32_0 = arith.constant 0 : i32
    %c0_i32_1 = arith.constant 0 : i32
    return %c0_i32, %c0_i32_0 : i32, i32
  }
  func.func @transform_8(%arg0: i32) -> (i32, i32) {
    %c0_i32 = arith.constant 0 : i32
    %c0_i32_0 = arith.constant 0 : i32
    %c0_i32_1 = arith.constant 0 : i32
    return %c0_i32, %c0_i32_0 : i32, i32
  }
  func.func @transform_9(%arg0: i32) -> (i32, i32) {
    %c0_i32 = arith.constant 0 : i32
    %c0_i32_0 = arith.constant 0 : i32
    return %arg0, %c0_i32 : i32, i32
  }
}

</mosaic_0001>

<bundles_post_ra>
// kernel: tpu_custom_call.1
= control target key start
LH: loop header
LB: loop body
LE: loop exit
PB: predicated region body
PF: predicated region fallthrough
CT: control target
= control target key end

     0   :  { %s1739_s0 = inlined_call_operand.hbm [shape: f32[16,16], index: 0, kind: input, shape index: {}]   ;;  %s1740_s1 = inlined_call_operand.hbm [shape: bf16[16,128], index: 1, kind: input, shape index: {}]   ;;  %s1741_s2 = inlined_call_operand.vmem [shape: f32[1,128], index: 2, kind: input, shape index: {}]   ;;  %s1742_s3 = inlined_call_operand.hbm [shape: bf16[128,128], index: 3, kind: input, shape index: {}]   ;;  %s1743_s4 = inlined_call_operand.vmem [shape: f32[1,128], index: 4, kind: input, shape index: {}]   ;;  %s1744_s5 = inlined_call_operand.hbm [shape: bf16[128,128], index: 5, kind: input, shape index: {}]   ;;  %s1745_s6 = inlined_call_operand.vmem [shape: f32[1,128], index: 6, kind: input, shape index: {}]   ;;  %s1746_s7 = inlined_call_operand.hbm [shape: bf16[128,128], index: 7, kind: input, shape index: {}]   ;;  %s1747_s8 = inlined_call_operand.vmem [shape: f32[1,128], index: 8, kind: input, shape index: {}]   ;;  %s1748_s9 = inlined_call_operand.hbm [shape: f32[16,128], index: 9, kind: output, shape index: {}]  }
   0x1   :  { %1753 = sst [smem:[#allocation16_spill]] %s1740_s1 }
   0x2   :  { %1754 = sst [smem:[#allocation17_spill]] %s1742_s3 }
   0x3   :  { %1755 = sst [smem:[#allocation18_spill]] %s1744_s5 }
   0x4   :  { %1756 = sst [smem:[#allocation19_spill]] %s1746_s7 }
   0x5   :  { %14 = vsyncpa [#allocation3], 0 }
   0x6   :  { %16 = vsyncpa [#allocation3 + $0x1], 0 }
   0x7   :  { %17 = vsyncpa [#allocation6], 0 }
   0x8   :  { %18 = vsyncpa [#allocation9], 0 }
   0x9   :  { %19 = vsyncpa [#allocation4], 0 }
   0xa   :  { %21 = vsyncpa [#allocation4 + $0x1], 0  ;;  %s1463_s30 = smov 0   ;;  %s1465_s10 = smov 0  }
   0xb   :  { %s1467_s11 = smov 0   ;;  %s1469_s12 = smov 0  }
   0xc LB: > { %s1403_s13 = smov [#allocation5]   ;;  %s1484_s15 = sadd.s32 4294967295, %s1401_s12   ;;  %s1401_s12 = sphi %s1469_s12, %s1780_s12   ;;  %s1397_s11 = sphi %s1467_s11, %s1779_s11   ;;  %s1393_s10 = sphi %s1465_s10, %s1778_s10   ;;  %s1389_s30 = sphi %s1463_s30, %s1777_s30  }
   0xd   : > { %s264_s14 = sshll.u32 %s1403_s13, 4  ;;  %p931_p0 = scmp.ge.s32.totalorder %s1401_s12, 1  ;;  %s265_s14 = int_to_ptr.vmem [resolvable:$true] %s264_s14 }
   0xe   : > { %p1749_p1 = scmp.eq.s32.totalorder %s1484_s15, 0  ;;  %p252_p2 = scmp.lt.s32.totalorder %s1401_s12, 3 }
   0xf   : > { %s1404_s17 = smov [#allocation8]   ;;  %s1405_s20 = smov [#allocation7]  }
  0x10   : > { %p1489_p3 = pnand %p931_p0, %p252_p2  ;;  %s296_s18 = sshll.u32 %s1404_s17, 4  ;;  %s1502_s18 = int_to_ptr.vmem [resolvable:$true] %s296_s18 }
  0x11   : > { %s280_s21 = sshll.u32 %s1405_s20, 4  ;;  %s1208_s22 = scalar_lea.vmem %s265_s14, 128  ;;  %s1504_s21 = int_to_ptr.vmem [resolvable:$true] %s280_s21 }
  0x12   : > { %s1757_s16 = scalar_select %p1489_p3, 1, 0 }
  0x13   : > { %p1095_p5 = pneg %p1489_p3  ;;  %p1209_p8 = scmp.ne.s32.totalorder %s265_s14, %s1208_s22 }
  0x14   : > { %p1216_p11 = scmp.lt.s32.totalorder %s265_s14, %s265_s14  ;;  %p1217_p12 = scmp.lt.s32.totalorder %s1208_s22, %s1208_s22 }
  0x15   : > { %p1498_p6 = pnand %p1095_p5, %p1749_p1 }
  0x16   : > { %p1218_p13 = por %p1217_p12, %p1216_p11 }
  0x17   : > { %p1199_p7 = pneg %p1498_p6 }
  0x19   : > { %p1211_p9 = pnand %p1209_p8, %p1199_p7 }
  0x1b   : > { %p1212_p10 = pneg %p1211_p9 }
  0x1d   : > { %p1219_p0 = pnand %p1218_p13, %p1212_p10 }
  0x1f   : > { %1222 = shalt.err (!%p1219_p0)
}
  0x20   : > { %s1406_s23 = smov 64   ;;  %s1407_s24 = smov 4  }
  0x21   : > { %s1759_s1 = sld [smem:[#allocation16_spill]]  ;;  %s1234_s27 = scalar_lea.vmem %s1502_s18, 1024 }
  0x22   : > { %p1235_p2 = scmp.ne.s32.totalorder %s1502_s18, %s1234_s27  ;;  %p1242_p9 = scmp.lt.s32.totalorder %s1502_s18, %s1502_s18 }
  0x23   : > { %p1243_p10 = scmp.lt.s32.totalorder %s1234_s27, %s1234_s27 }
  0x24   : > { %p1237_p5 = pnand %p1235_p2, %p1199_p7 }
  0x25   : > { %p1244_p11 = por %p1243_p10, %p1242_p9 }
  0x26   : > { %p1238_p8 = pneg %p1237_p5 }
  0x27   : > { %1098 = dma.hbm_to_vmem [thread:$0]  (!%p1498_p6), %s1759_s1, 128, %s265_s14, [#allocation6], %s1406_s23, %s1406_s23, %s1407_s24  }
  0x28   : > { %p1245_p12 = pnand %p1244_p11, %p1238_p8 }
  0x2a   : > { %1248 = shalt.err (!%p1245_p12)
}
  0x2b   : > { %s1760_s5 = sld [smem:[#allocation18_spill]]  ;;  %s1260_s13 = scalar_lea.vmem %s1504_s21, 1024 }
  0x2c   : > { %p1261_p13 = scmp.ne.s32.totalorder %s1504_s21, %s1260_s13  ;;  %p1268_p5 = scmp.lt.s32.totalorder %s1504_s21, %s1504_s21 }
  0x2d   : > { %p1269_p8 = scmp.lt.s32.totalorder %s1260_s13, %s1260_s13 }
  0x2e   : > { %p1263_p0 = pnand %p1261_p13, %p1199_p7 }
  0x2f   : > { %p1270_p9 = por %p1269_p8, %p1268_p5 }
  0x30   : > { %p1264_p2 = pneg %p1263_p0 }
  0x31   : > { %1104 = dma.hbm_to_vmem [thread:$0]  (!%p1498_p6), %s1760_s5, 1024, %s1502_s18, [#allocation9], %s1406_s23, %s1406_s23, %s1407_s24  }
  0x32   : > { %p1271_p10 = pnand %p1270_p9, %p1264_p2 }
  0x34   : > { %1274 = shalt.err (!%p1271_p10)
}
  0x35   : > { %s1761_s3 = sld [smem:[#allocation17_spill]]  ;;  %s1408_s18 = smov [#allocation10]  }
  0x36   : > { %s312_s20 = sshll.u32 %s1408_s18, 4  ;;  %s313_s20 = int_to_ptr.vmem [resolvable:$true] %s312_s20 }
  0x37   : > { %s1286_s22 = scalar_lea.vmem %s313_s20, 1024  ;;  %p1294_p0 = scmp.lt.s32.totalorder %s313_s20, %s313_s20 }
  0x38   : > { %p1287_p11 = scmp.ne.s32.totalorder %s313_s20, %s1286_s22  ;;  %p1295_p2 = scmp.lt.s32.totalorder %s1286_s22, %s1286_s22 }
  0x3a   : > { %p1289_p12 = pnand %p1287_p11, %p1199_p7  ;;  %p1296_p5 = por %p1295_p2, %p1294_p0 }
  0x3b   : > { %1101 = dma.hbm_to_vmem [thread:$0]  (!%p1498_p6), %s1761_s3, 1024, %s1504_s21, [#allocation6], %s1406_s23, %s1406_s23, %s1407_s24  }
  0x3c   : > { %p1290_p13 = pneg %p1289_p12 }
  0x3e   : > { %p1297_p8 = pnand %p1296_p5, %p1290_p13 }
  0x40   : > { %1300 = shalt.err (!%p1297_p8)
}
  0x41   : > { %s1762_s7 = sld [smem:[#allocation19_spill]]  ;;  %s930_s19 = sadd.s32 4294967294, %s1401_s12  }
  0x42   : > { %s1564_s26 = sadd.s32 1, %s1401_s12   ;;  %s34_s28 = sadd.s32 1, %s1397_s11 }
  0x43   : > { %s31_s27 = ssub.s32 %s1401_s12, %s1564_s26  ;;  %p41_p9 = scmp.ne.s32.totalorder %s1397_s11, %s1393_s10 }
  0x44   : > { %p32_p7 = scmp.eq.s32.totalorder %s31_s27, 0  ;;  %p42_p10 = scmp.eq.s32.totalorder %s1401_s12, 0 }
  0x45   : > { %p47_p11 = scmp.ne.s32.totalorder %s1393_s10, %s1389_s30  ;;  %p239_p13 = scmp.eq.s32.totalorder %s1484_s15, 1 }
  0x46   : > { %s1575_s29 = scalar_select %p32_p7, %s1397_s11, %s34_s28  }
  0x47   : > { %1107 = dma.hbm_to_vmem [thread:$0]  (!%p1498_p6), %s1762_s7, 1024, %s313_s20, [#allocation9], %s1406_s23, %s1406_s23, %s1407_s24  }
  0x48   : > { %p1577_p12 = por %p42_p10, %p41_p9  ;;  %p1583_p6 = por %p1749_p1, %p47_p11 }
  0x49   : > { %p245_p0 = scmp.eq.s32.totalorder %s930_s19, 1  ;;  %p1120_p2 = scmp.lt.s32.totalorder %s1401_s12, 2 }
  0x4a   : > { %s1764_s23 = scalar_select %p1583_p6, 1, 0 }
  0x4b   : > { %s329_s24 = sand.u32 1, %s1397_s11   ;;  %p1590_p5 = por %p239_p13, %p41_p9 }
  0x4c   : > { %p1594_p8 = por %p245_p0, %p47_p11  ;;  %s937_s18 = sshll.u32 %s329_s24, 3 }
  0x4d   : > { %s1765_s14 = scalar_select %p1590_p5, 1, 0 }
  0x4e   : > { %s1766_s17 = scalar_select %p1594_p8, 1, 0 }
  0x4f   : > { %s938_s20 = sshll.u32 %s1401_s12, 7  ;;  %s333_s19 = scalar_lea.vmem [#allocation2], %s937_s18 }
  0x50   : > { %s1602_s25 = scalar_lea.hbm %s1739_s0, %s938_s20  ;;  %s340_s27 = sshll.u32 %s333_s19, 4  ;;  %s341_s27 = int_to_ptr.vmem [resolvable:$true] %s340_s27 }
  0x51   : > { %p1606_p7 = pnand %p1120_p2, %p1577_p12  ;;  %s330_s1 = scalar_lea.sflag [#allocation3], %s329_s24 }
  0x52   : > { %s1301_s3 = scalar_lea.hbm %s1602_s25, 128  ;;  %s1306_s21 = scalar_lea.hbm %s1739_s0, 256 }
  0x53   : > { %p1302_p9 = scmp.ne.s32.totalorder %s1602_s25, %s1301_s3  ;;  %p1303_p10 = pneg %p1606_p7 }
  0x54   : > { %p1307_p0 = scmp.lt.s32.totalorder %s1602_s25, %s1739_s0  ;;  %p1308_p12 = scmp.lt.s32.totalorder %s1306_s21, %s1301_s3 }
  0x55   : > { %p1304_p11 = pnand %p1303_p10, %p1302_p9 }
  0x56   : > { %p1309_p2 = por %p1308_p12, %p1307_p0 }
  0x57   : > { %p1305_p13 = pneg %p1304_p11 }
  0x59   : > { %p1310_p4 = pnand %p1309_p2, %p1305_p13 }
  0x5b   : > { %1313 = shalt.err (!%p1310_p4)
}
  0x5c   : > { %s1314_s13 = scalar_lea.vmem %s341_s27, 128  ;;  %s1409_s24 = smov [#allocation2]  }
  0x5d   : > { %p1315_p1 = scmp.ne.s32.totalorder %s341_s27, %s1314_s13  ;;  %s1319_s5 = sshll.u32 %s1409_s24, 4  ;;  %s1320_s5 = int_to_ptr.vmem [resolvable:$false] %s1319_s5 }
  0x5e   : > { %s1321_s7 = scalar_lea.vmem %s1320_s5, 256  ;;  %p1322_p9 = scmp.lt.s32.totalorder %s341_s27, %s1320_s5 }
  0x5f   : > { %p1317_p8 = pnand %p1315_p1, %p1303_p10  ;;  %p1323_p11 = scmp.lt.s32.totalorder %s1321_s7, %s1314_s13 }
  0x61   : > { %p1318_p5 = pneg %p1317_p8  ;;  %p1324_p6 = por %p1323_p11, %p1322_p9 }
  0x63   : > { %p1325_p3 = pnand %p1324_p6, %p1318_p5 }
  0x65   : > { %1328 = shalt.err (!%p1325_p3)
}
  0x66   : > { %1111 = dma.hbm_to_vmem [thread:$0]  (!%p1606_p7), %s1602_s25, 128, %s341_s27, %s330_s1  }
  0x67   : > { %p1768_p13 = scmp.ne.s32.totalorder %s1757_s16, 0 }
  0x68   : > { %s1627_s3 = sand.u32 (!%p1768_p13), 1, %s1393_s10   ;;  %p1769_p1 = scmp.ne.s32.totalorder (!%p1768_p13), %s1764_s23, 0 }
  0x69   : > { %349 = sbr.rel (%p1768_p13) target bundleno = 965 (0x3c5), region = 56  ;;  %s940_s20 = sshll.u32 (!%p1768_p13), %s1627_s3, 3 }
  0x6a   : > { %s352_s5 = scalar_lea.sflag (!%p1768_p13), [#allocation3], %s1627_s3  ;;  %s355_s7 = scalar_lea.vmem (!%p1768_p13), [#allocation2], %s940_s20 }
  0x6e   : > { %1372 = dma.done.wait (%p1769_p1), %s352_s5, 128  }
  0x6f   : > { %1374 = vsyncadd (%p1769_p1), %s352_s5, 4294967168  ;;  %p1770_p3 = scmp.eq.s32.totalorder %s1484_s15, 0 }
  0x71   : > { %1376 = dma.done.wait (%p1770_p3), [#allocation6], 1152   ;;  %p1771_p4 = pmov %p1770_p3 }
  0x72   : > { %p1772_p6 = pmov %p1770_p3 }
  0x73   : > { %1378 = vsyncadd (%p1771_p4), [#allocation6], 4294966144 }
  0x74   : > { %1380 = dma.done.wait (%p1772_p6), [#allocation9], 2048   ;;  %p1773_p5 = pmov %p1770_p3 }
  0x75   : > { %v1410_v0 = vmov 0.0   ;;  %vm1411_vm0 = vmmov 0   ;;  %v1166_v1 = vld [vmem:[#allocation5] sm:$0xff]   ;;  %v407_v2 = vld [vmem:[%s355_s7] sm:$0xff]  ;;  %vm424_vm1 = vcmask 130048   ;;  %v1170_v7 = vld [vmem:[#allocation7 + $0x20] sm:$0xff]  }
  0x76   : > { %1382 = vsyncadd (%p1773_p5), [#allocation9], 4294965248  ;;  %1009 = vmatprep.subr.bf16.mxu0 %v1410_v0  ;;  %1011 = vmatprep.mubr.msk.bf16.mxu0 %vm1411_vm0, %v1410_v0  ;;  %v408_v3 = vpack.c.bf16 %v407_v2, %v407_v2  ;;  %v1167_v4 = vld [vmem:[#allocation7 + $0x38] sm:$0xff]   ;;  %v1168_v5 = vld [vmem:[#allocation7 + $0x30] sm:$0xff]   ;;  %s977_s18 = sshll.u32 %s1484_s15, 7  ;;  %s405_s19 = scalar_lea.vmem [#allocation11], %s940_s20 }
  0x77   : > { %1015 = vmatprep.subr.bf16.mxu1 %v1410_v0  ;;  %1031 = vmatprep.mubr.msk.bf16.mxu1 %vm1411_vm0, %v1410_v0  ;;  %v1169_v6 = vld [vmem:[#allocation7 + $0x28] sm:$0xff]   ;;  %v1171_v8 = vld [vmem:[#allocation7 + $0x18] sm:$0xff]   ;;  %v1172_v9 = vld [vmem:[#allocation7 + $0x10] sm:$0xff]   ;;  %s822_s13 = sshll.u32 %s405_s19, 4  ;;  %s1696_s7 = scalar_lea.hbm %s1748_s9, %s977_s18  ;;  %s1698_s13 = int_to_ptr.vmem [resolvable:$true] %s822_s13 }
  0x78   : > { %1010 = vmatpush3.bf16.msra.mxu0 %v1166_v1  ;;  %1016 = vmatpush3.bf16.msra.mxu1 %v1167_v4  ;;  %v1173_v10 = vld [vmem:[#allocation7 + $0x8] sm:$0xff]   ;;  %v1174_v11 = vld [vmem:[#allocation7] sm:$0xff]   ;;  %v1175_v12 = vld [vmem:[#allocation8 + $0x38] sm:$0xff]   ;;  %s809_s1 = scalar_lea.sflag [#allocation4], %s1627_s3  ;;  %s1329_s15 = scalar_lea.vmem %s1698_s13, 128 }
  0x79   : > { %1035 = vmatprep.subr.bf16.mxu0 %v1410_v0  ;;  %1017 = vmatprep.subr.bf16.mxu1 %v1410_v0  ;;  %v1176_v13 = vld [vmem:[#allocation8 + $0x30] sm:$0xff]   ;;  %v1177_v14 = vld [vmem:[#allocation8 + $0x28] sm:$0xff]   ;;  %v1178_v23 = vld [vmem:[#allocation8 + $0x20] sm:$0xff]   ;;  %p1330_p8 = scmp.ne.s32.totalorder %s1698_s13, %s1329_s15  ;;  %p1774_p7 = scmp.ne.s32.totalorder %s1765_s14, 0 }
  0x7a   : > { %v946_v15 = vld [vmem:[%s1741_s2] ss:$0 sm:$0xff]  ;;  %v1179_v24 = vld [vmem:[#allocation8 + $0x18] sm:$0xff]   ;;  %v1180_v25 = vld [vmem:[#allocation8 + $0x10] sm:$0xff]   ;;  %s1412_s20 = smov [#allocation11]  }
  0x7b   : > { %1012 = vmatmul.mubr.msk.bf16.vlgmr.msra.gmra.mxu0 %vm424_vm1, %v408_v3  ;;  %v1181_v26 = vld [vmem:[#allocation8 + $0x8] sm:$0xff]   ;;  %v1182_v27 = vld [vmem:[#allocation8] sm:$0xff]   ;;  %v1183_v28 = vld [vmem:[#allocation10 + $0x38] sm:$0xff]   ;;  %p1331_p10 = pnand %p1330_p8, %p1774_p7  ;;  %s1333_s16 = sshll.u32 %s1412_s20, 4  ;;  %s1334_s16 = int_to_ptr.vmem [resolvable:$false] %s1333_s16 }
  0x7c   : > { %1051 = vmatprep.mubr.msk.bf16.mxu0 %vm1411_vm0, %v1410_v0  ;;  %1018 = vmatpush3.bf16.msra.mxu1 %v1168_v5  ;;  %v1184_v29 = vld [vmem:[#allocation10 + $0x30] sm:$0xff]   ;;  %v1185_v30 = vld [vmem:[#allocation10 + $0x28] sm:$0xff]   ;;  %v1186_v39 = vld [vmem:[#allocation10 + $0x20] sm:$0xff]   ;;  %s1335_s23 = scalar_lea.vmem %s1334_s16, 256  ;;  %p1336_p12 = scmp.lt.s32.totalorder %s1698_s13, %s1334_s16 }
  0x7d   : > { %1019 = vmatprep.subr.bf16.mxu1 %v1410_v0  ;;  %1036 = vmatpush3.bf16.msra.mxu0 %v1175_v12  ;;  %v949_v31 = vld [vmem:[%s1743_s4] ss:$0 sm:$0xff]  ;;  %v1187_v40 = vld [vmem:[#allocation10 + $0x18] sm:$0xff]   ;;  %v1188_v41 = vld [vmem:[#allocation10 + $0x10] sm:$0xff]   ;;  %p1332_p0 = pneg %p1331_p10  ;;  %p1337_p2 = scmp.lt.s32.totalorder %s1335_s23, %s1329_s15 }
  0x7e   : > { %1037 = vmatprep.subr.bf16.mxu0 %v1410_v0  ;;  %v1189_v42 = vld [vmem:[#allocation10 + $0x8] sm:$0xff]   ;;  %v1190_v43 = vld [vmem:[#allocation10] sm:$0xff]  }
  0x7f   : > { %v958_v44 = vld [vmem:[%s1745_s6] ss:$0 sm:$0xff]  ;;  %p1338_p9 = por %p1337_p2, %p1336_p12 }
  0x80   : > { %1020 = vmatpush3.bf16.msra.mxu1 %v1169_v6  ;;  %v967_v52 = vld [vmem:[%s1747_s8] ss:$0 sm:$0xff] }
  0x81   : > { %1021 = vmatprep.subr.bf16.mxu1 %v1410_v0  ;;  %1038 = vmatpush3.bf16.msra.mxu0 %v1176_v13  ;;  %p1339_p11 = pnand %p1338_p9, %p1332_p0 }
  0x82   : > { %1039 = vmatprep.subr.bf16.mxu0 %v1410_v0 }
  0x84   : > { %1022 = vmatpush3.bf16.msra.mxu1 %v1170_v7 }
  0x85   : > { %1023 = vmatprep.subr.bf16.mxu1 %v1410_v0  ;;  %1040 = vmatpush3.bf16.msra.mxu0 %v1177_v14 }
  0x86   : > { %1041 = vmatprep.subr.bf16.mxu0 %v1410_v0 }
  0x88   : > { %1024 = vmatpush3.bf16.msra.mxu1 %v1171_v8 }
  0x89   : > { %1025 = vmatprep.subr.bf16.mxu1 %v1410_v0  ;;  %1042 = vmatpush3.bf16.msra.mxu0 %v1178_v23 }
  0x8a   : > { %1043 = vmatprep.subr.bf16.mxu0 %v1410_v0 }
  0x8c   : > { %1026 = vmatpush3.bf16.msra.mxu1 %v1172_v9 }
  0x8d   : > { %1027 = vmatprep.subr.bf16.mxu1 %v1410_v0  ;;  %1044 = vmatpush3.bf16.msra.mxu0 %v1179_v24 }
  0x8e   : > { %1045 = vmatprep.subr.bf16.mxu0 %v1410_v0 }
  0x90   : > { %1028 = vmatpush3.bf16.msra.mxu1 %v1173_v10 }
  0x91   : > { %1029 = vmatprep.subr.bf16.mxu1 %v1410_v0  ;;  %1046 = vmatpush3.bf16.msra.mxu0 %v1180_v25 }
  0x92   : > { %1047 = vmatprep.subr.bf16.mxu0 %v1410_v0 }
  0x94   : > { %1030 = vmatpush3.bf16.msra.mxu1 %v1174_v11 }
  0x95   : > { %1055 = vmatprep.subr.bf16.mxu1 %v1410_v0  ;;  %1048 = vmatpush3.bf16.msra.mxu0 %v1181_v26 }
  0x96   : > { %1049 = vmatprep.subr.bf16.mxu0 %v1410_v0 }
  0x99   : > { %1050 = vmatpush3.bf16.msra.mxu0 %v1182_v27 }
 0x13b   : > { %v462_v16 = vpop.f32.mrf.mxu0 }
 0x13c   : > { %v463_v17 = vadd.f32 %v946_v15, %v462_v16 }
 0x13d   : > { %v1013_v18 = vpop.f32.mrf.mxu0 }
 0x13e   : > { %1191 = vtanh.f32 %v463_v17 }
 0x13f   : > { %v465_v19 = vpop.f32.mrf.mxu0 }
 0x141   : > { %v1014_v20 = vpop.f32.mrf.mxu0 }
 0x14b   : > { %v1192_v21 = vpop.eup %1191 }
 0x14c   : > { %v469_v22 = vpack.c.bf16 %v1192_v21, %v1192_v21 }
 0x14e   : > { %1032 = vmatmul.mubr.bf16.vlgmr.msra.gmra.mxu1 %v469_v22 }
 0x14f   : > { %1071 = vmatprep.mubr.msk.bf16.mxu1 %vm1411_vm0, %v1410_v0  ;;  %1056 = vmatpush3.bf16.msra.mxu1 %v1183_v28 }
 0x150   : > { %1057 = vmatprep.subr.bf16.mxu1 %v1410_v0 }
 0x153   : > { %1058 = vmatpush3.bf16.msra.mxu1 %v1184_v29 }
 0x154   : > { %1059 = vmatprep.subr.bf16.mxu1 %v1410_v0 }
 0x157   : > { %1060 = vmatpush3.bf16.msra.mxu1 %v1185_v30 }
 0x158   : > { %1061 = vmatprep.subr.bf16.mxu1 %v1410_v0 }
 0x15b   : > { %1062 = vmatpush3.bf16.msra.mxu1 %v1186_v39 }
 0x15c   : > { %1063 = vmatprep.subr.bf16.mxu1 %v1410_v0 }
 0x15f   : > { %1064 = vmatpush3.bf16.msra.mxu1 %v1187_v40 }
 0x160   : > { %1065 = vmatprep.subr.bf16.mxu1 %v1410_v0 }
 0x163   : > { %1066 = vmatpush3.bf16.msra.mxu1 %v1188_v41 }
 0x164   : > { %1067 = vmatprep.subr.bf16.mxu1 %v1410_v0 }
 0x167   : > { %1068 = vmatpush3.bf16.msra.mxu1 %v1189_v42 }
 0x168   : > { %1069 = vmatprep.subr.bf16.mxu1 %v1410_v0 }
 0x16b   : > { %1070 = vmatpush3.bf16.msra.mxu1 %v1190_v43 }
 0x20e   : > { %v575_v32 = vpop.f32.mrf.mxu1 }
 0x20f   : > { %v576_v33 = vadd.f32 %v949_v31, %v575_v32 }
 0x210   : > { %v1033_v34 = vpop.f32.mrf.mxu1 }
 0x211   : > { %1193 = vtanh.f32 %v576_v33 }
 0x212   : > { %v578_v35 = vpop.f32.mrf.mxu1 }
 0x214   : > { %v1034_v36 = vpop.f32.mrf.mxu1 }
 0x21e   : > { %v1194_v37 = vpop.eup %1193 }
 0x21f   : > { %v582_v38 = vpack.c.bf16 %v1194_v37, %v1194_v37 }
 0x221   : > { %1052 = vmatmul.mubr.bf16.vlgmr.msra.gmra.mxu0 %v582_v38 }
 0x2e1   : > { %v688_v45 = vpop.f32.mrf.mxu0 }
 0x2e2   : > { %v689_v46 = vadd.f32 %v958_v44, %v688_v45 }
 0x2e3   : > { %v1053_v47 = vpop.f32.mrf.mxu0 }
 0x2e4   : > { %1195 = vtanh.f32 %v689_v46 }
 0x2e5   : > { %v691_v48 = vpop.f32.mrf.mxu0 }
 0x2e7   : > { %v1054_v49 = vpop.f32.mrf.mxu0 }
 0x2f1   : > { %v1196_v50 = vpop.eup %1195 }
 0x2f2   : > { %v695_v51 = vpack.c.bf16 %v1196_v50, %v1196_v50 }
 0x2f4   : > { %1072 = vmatmul.mubr.bf16.vlgmr.msra.gmra.mxu1 %v695_v51 }
 0x3b4   : > { %v801_v53 = vpop.f32.mrf.mxu1 }
 0x3b5   : > { %v802_v54 = vadd.f32 %v967_v52, %v801_v53 }
 0x3b6   : > { %v1073_v55 = vpop.f32.mrf.mxu1 }
 0x3b7   : > { %807 = vst [vmem:[%s405_s19] sm:$0xff] %v802_v54 }
 0x3b8   : > { %v804_v56 = vpop.f32.mrf.mxu1 }
 0x3b9   : > { %1342 = shalt.err (!%p1339_p11)
}
 0x3ba   : > { %s1343_s25 = scalar_lea.hbm %s1696_s7, 128  ;;  %s1347_s28 = scalar_lea.hbm %s1748_s9, 256 }
 0x3bb   : > { %p1344_p13 = scmp.ne.s32.totalorder %s1696_s7, %s1343_s25  ;;  %p1348_p4 = scmp.lt.s32.totalorder %s1696_s7, %s1748_s9 }
 0x3bc   : > { %p1349_p6 = scmp.lt.s32.totalorder %s1347_s28, %s1343_s25 }
 0x3bd   : > { %p1345_p1 = pnand %p1344_p13, %p1774_p7 }
 0x3be   : > { %p1350_p5 = por %p1349_p6, %p1348_p4 }
 0x3bf   : > { %p1346_p3 = pneg %p1345_p1 }
 0x3c1   : > { %p1351_p8 = pnand %p1350_p5, %p1346_p3 }
 0x3c3   : > { %1354 = shalt.err (!%p1351_p8)
}
 0x3c4   : > { %1093 = dma.vmem_to_hbm [thread:$0]  (%p1774_p7), %s1698_s13, 128, %s1696_s7, %s809_s1   ;;  %v1074_v57 = vpop.f32.mrf.mxu1 }
 0x3c5 PF: > { %s834_s18 = sand.u32 1, %s1389_s30   ;;  %p1775_p10 = scmp.ne.s32.totalorder %s1766_s17, 0 }
 0x3c6   : > { %p1776_p0 = scmp.ge.s32.totalorder %s1401_s12, 2  ;;  %s835_s19 = scalar_lea.sflag [#allocation4], %s834_s18 }
 0x3c8   : > { %p1113_p12 = pnand %p1776_p0, %p1775_p10 }
 0x3ca   : > { %p1114_p2 = pneg %p1113_p12 }
 0x3cc   : > { %1384 = dma.done.wait (%p1114_p2), %s835_s19, 128  }
 0x3cd   : > { %1386 = vsyncadd (%p1114_p2), %s835_s19, 4294967168  ;;  %p24_p9 = scmp.ge.s32.totalorder %s1564_s26, 4   ;;  %s1777_s30 = smov %s1393_s10 }
 0x3ce   : > { %s1778_s10 = smov %s1397_s11  ;;  %s1779_s11 = smov %s1575_s29 }
 0x3cf   : > { %s1780_s12 = smov %s1564_s26  ;;  %26 = sbr.rel (!%p24_p9) target bundleno = 12 (0xc), region = 117 }
 0x3d4   :  { %840 = vsyncpa [#allocation3], 1 }
 0x3d5   :  { %842 = vsyncpa [#allocation3 + $0x1], 1 }
 0x3d6   :  { %843 = vsyncpa [#allocation6], 1 }
 0x3d7   :  { %844 = vsyncpa [#allocation9], 1 }
 0x3d8   :  { %845 = vsyncpa [#allocation4], 1 }
 0x3d9   :  { %847 = vsyncpa [#allocation4 + $0x1], 1 }

</bundles_post_ra>
